<compile_context>
chip_gen: v6e
topology: v6e:2x2x1
jax: 0.10.0
libtpu: 0.0.40
codegen_flags: <defaults>
</compile_context>

<pallas_src>
import functools

import jax
import jax.numpy as jnp
from jax import lax
from jax.experimental import pallas as pl
from jax.experimental.pallas import tpu as pltpu


def _round_up(x, m):
    return ((x + m - 1) // m) * m


def _vmem_capacity_bytes():
    """Physical VMEM per TensorCore (128 MiB on v5e/v6e, 64 MiB on v7x)."""
    try:
        cap = getattr(pltpu.get_tpu_info(), "vmem_capacity_bytes", None)
        if cap:
            return int(cap)
    except Exception:
        pass
    return 64 * 1024 * 1024     # conservative default (v7x per-core figure)


def _maybe_buffered_spec(block_shape, index_map, depth):
    """BlockSpec with N-deep pipelining if supported, plain spec otherwise."""
    try:
        return pl.BlockSpec(block_shape, index_map,
                            pipeline_mode=pl.Buffered(depth))
    except Exception:
        return pl.BlockSpec(block_shape, index_map)


def _scatter_mean_kernel(col_ref, ea_ref, out_ref, acc_ref, *,
                         f, tn, te, ea_resident):
    nb = pl.program_id(0)          # node-block axis ("parallel")
    k = pl.program_id(1)           # edge-block reduction axis (last, "arbitrary")

    @pl.when(k == 0)
    def _():
        acc_ref[...] = jnp.zeros_like(acc_ref)

    # Destination ids of this edge block, lane-major (1, TE).  col is fully
    # VMEM resident; padded edges carry -1 and never match any node id.
    col = col_ref[pl.ds(k, 1), :]

    # Edge features for this block: sliced out of the VMEM-resident copy, or
    # the streamed (TE, F_pad) tile delivered by the BlockSpec pipeline.
    if ea_resident:
        e_start = pl.multiple_of(k * te, te)
        ea = ea_ref[pl.ds(e_start, te), :]
    else:
        ea = ea_ref[...]

    # (TN, 1) node ids owned by this node block (cheap sublane iota).
    node_ids = lax.broadcasted_iota(jnp.int32, (tn, 1), 0) + nb * tn
    # (TN, TE) one-hot scatter matrix; contraction is on the lane (last) dim
    # so the matmul is in canonical MXU layout (no XLU transpose).
    onehot = (node_ids == col).astype(ea.dtype)

    # MXU: (TN, TE) @ (TE, F_pad) -> (TN, F_pad).  Column `f` of ea is all
    # ones, so column `f` of the accumulator is the per-node in-degree (the
    # count reduction rides the same matmul for free).
    acc_ref[...] += jnp.dot(onehot, ea, preferred_element_type=jnp.float32)

    @pl.when(k == pl.num_programs(1) - 1)
    def _():
        acc = acc_ref[...]
        cnt = acc[:, f:f + 1]                            # fused in-degree
        # Reciprocal on the narrow (TN, 1) count column + broadcast multiply
        # (cheaper than a full-tile divide).  approx=False keeps the result
        # bit-close to exact division so we match torch_scatter tightly.
        inv = pl.reciprocal(jnp.maximum(cnt, 1.0), approx=False)
        out_ref[...] = (acc * inv).astype(out_ref.dtype)


def node_model_in(x, edge_index, edge_attr, *,
                  node_block=512, edge_block=1024):
    """Pallas implementation of NodeModelIn(reduce='mean').forward.

    node_block: output rows per grid step (keep >=2 node blocks on v7x so the
                "parallel" axis feeds both TensorCores).
    edge_block: MXU contraction depth per grid step.
    """
    n = x.shape[0]
    e, f = edge_attr.shape

    f_pad = _round_up(f + 1, 128)                     # +1 fused count column
    tn = min(node_block, _round_up(max(n, 1), 128))   # clamp to problem size
    te = min(edge_block, _round_up(max(e, 1), 128))
    n_pad = _round_up(max(n, 1), tn)
    e_pad = _round_up(max(e, 1), te)
    n_blocks = n_pad // tn
    e_blocks = e_pad // te

    itemsize = jnp.dtype(edge_attr.dtype).itemsize
    vmem_cap = _vmem_capacity_bytes()
    ea_bytes = e_pad * f_pad * itemsize
    col_bytes = e_blocks * te * 4
    # Keep edge_attr fully VMEM resident when it comfortably fits (budget
    # assumes the pipeline may still hold two buffers of the constant block).
    ea_resident = (2 * ea_bytes + 2 * col_bytes) <= int(0.55 * vmem_cap)
    vmem_limit = min(int(0.85 * vmem_cap), 100 * 1024 * 1024)

    # Augmented edge features: [edge_attr | 1 | 0 ... 0]; padded edge rows are
    # all zero so they contribute nothing to sums or counts.
    ea_aug = jnp.concatenate(
        [edge_attr, jnp.ones((e, 1), edge_attr.dtype)], axis=-1)
    ea_aug = jnp.pad(ea_aug, ((0, e_pad - e), (0, f_pad - (f + 1))))

    # Destination ids, lane-major and blocked: (e_blocks, TE).  Padding is -1
    # so padded edges never match a node id.
    col = edge_index[1].astype(jnp.int32)
    col = jnp.pad(col, (0, e_pad - e), constant_values=-1).reshape(e_blocks, te)

    col_spec = pl.BlockSpec((e_blocks, te), lambda nb, k: (0, 0))  # resident
    if ea_resident:
        ea_spec = pl.BlockSpec((e_pad, f_pad), lambda nb, k: (0, 0))  # resident
    else:
        ea_spec = _maybe_buffered_spec((te, f_pad), lambda nb, k: (k, 0),
                                       depth=3)                       # streamed

    kernel = functools.partial(_scatter_mean_kernel, f=f, tn=tn, te=te,
                               ea_resident=ea_resident)

    out = pl.pallas_call(
        kernel,
        out_shape=jax.ShapeDtypeStruct((n_pad, f_pad), edge_attr.dtype),
        grid_spec=pltpu.PrefetchScalarGridSpec(
            num_scalar_prefetch=0,
            grid=(n_blocks, e_blocks),            # (node blocks, edge blocks)
            in_specs=[col_spec, ea_spec],
            out_specs=pl.BlockSpec((tn, f_pad), lambda nb, k: (nb, 0)),
            scratch_shapes=[pltpu.VMEM((tn, f_pad), jnp.float32)],
        ),
        compiler_params=pltpu.CompilerParams(
            dimension_semantics=("parallel", "arbitrary"),
            vmem_limit_bytes=vmem_limit,
        ),
    )(col, ea_aug)
    return out[:n, :f]


def _reference(x, edge_index, edge_attr):
    # Pure-JAX reference: scatter-mean over the destination (col) index.
    n = x.shape[0]
    col = edge_index[1]
    sums = jax.ops.segment_sum(edge_attr, col, num_segments=n)
    cnts = jax.ops.segment_sum(jnp.ones((edge_attr.shape[0],), jnp.float32),
                               col, num_segments=n)
    return sums / jnp.maximum(cnts, 1.0)[:, None]


if __name__ == "__main__":
    key = jax.random.PRNGKey(0)
    k_x, k_col, k_row, k_ea = jax.random.split(key, 4)

    N = 8      # nodes
    E = 32     # edges
    FX = 16    # node feature dim (only N is used by the module)
    FE = 32    # edge feature dim

    x = jax.random.normal(k_x, (N, FX), dtype=jnp.float32)
    row = jax.random.randint(k_row, (E,), 0, N, dtype=jnp.int32)
    col = jax.random.randint(k_col, (E,), 0, N, dtype=jnp.int32)
    edge_index = jnp.stack([row, col], axis=0)          # (2, E)
    edge_attr = jax.random.normal(k_ea, (E, FE), dtype=jnp.float32)

    out = node_model_in(x, edge_index, edge_attr)
    out = jax.block_until_ready(out)

    ref = _reference(x, edge_index, edge_attr)
    assert out.shape == (N, FE)
    assert jnp.allclose(out, ref, atol=1e-5, rtol=1e-5), "mismatch vs reference"

    print("KERNEL_OK")
</pallas_src>

<mosaic_0001>
module attributes {stable_mosaic.version = 11 : i64} {
  func.func @_scatter_mean_kernel(%arg0: i32, %arg1: i32, %arg2: memref<1x128xi32, #tpu.memory_space<vmem>>, %arg3: memref<128x128xf32, #tpu.memory_space<vmem>>, %arg4: memref<128x128xf32, #tpu.memory_space<vmem>>, %arg5: memref<128x128xf32, #tpu.memory_space<vmem>>) attributes {dimension_semantics = [#tpu.dimension_semantics<parallel>, #tpu.dimension_semantics<arbitrary>], iteration_bounds = array<i64: 1, 1>, scalar_prefetch = 0 : i64, scratch_operands = 1 : i64, tpu.core_type = #tpu.core_type<tc>, window_params = [{pipeline_mode = #tpu.pipeline_mode<synchronous>, transform_indices = @transform_0, window_bounds = array<i64: 1, 128>}, {pipeline_mode = #tpu.pipeline_mode<synchronous>, transform_indices = @transform_1, window_bounds = array<i64: 128, 128>}, {transform_indices = @transform_2, window_bounds = array<i64: 128, 128>}]} {
    %c0_i32 = arith.constant 0 : i32
    %0 = arith.cmpi eq, %arg1, %c0_i32 : i32
    %1 = arith.extui %0 : i1 to i32
    %c0_i32_0 = arith.constant 0 : i32
    %2 = arith.cmpi ne, %1, %c0_i32_0 : i32
    scf.if %2 {
      %cst_9 = arith.constant 0.000000e+00 : f32
      %25 = vector.broadcast %cst_9 : f32 to vector<128x128xf32>
      %c0_10 = arith.constant 0 : index
      %c0_11 = arith.constant 0 : index
      %26 = vector.load %arg5[%c0_10, %c0_11] : memref<128x128xf32, #tpu.memory_space<vmem>>, vector<128x128xf32>
      tpu.vector_store %arg5[%c0_10, %c0_11], %25 {strides = array<i32>} : memref<128x128xf32, #tpu.memory_space<vmem>>, vector<128x128xf32>,
    } else {
    }
    %3 = arith.index_cast %arg1 : i32 to index
    %c0 = arith.constant 0 : index
    %4 = vector.load %arg2[%3, %c0] : memref<1x128xi32, #tpu.memory_space<vmem>>, vector<1x128xi32>
    %c128_i32 = arith.constant 128 : i32
    %5 = arith.muli %arg1, %c128_i32 : i32
    %6 = tpu.assume_multiple %5, 128 : i32
    %7 = arith.index_cast %6 : i32 to index
    %c0_1 = arith.constant 0 : index
    %8 = vector.load %arg3[%7, %c0_1] : memref<128x128xf32, #tpu.memory_space<vmem>>, vector<128x128xf32>
    %9 = tpu.iota {dimensions = array<i32: 0>} : vector<128x1xi32>
    %c128_i32_2 = arith.constant 128 : i32
    %10 = arith.muli %arg0, %c128_i32_2 : i32
    %11 = vector.broadcast %10 : i32 to vector<128x1xi32>
    %12 = arith.addi %9, %11 : vector<128x1xi32>
    %13 = vector.broadcast %12 : vector<128x1xi32> to vector<128x128xi32>
    %14 = vector.broadcast %4 : vector<1x128xi32> to vector<128x128xi32>
    %15 = arith.cmpi eq, %13, %14 : vector<128x128xi32>
    %16 = arith.extui %15 : vector<128x128xi1> to vector<128x128xi32>
    %17 = arith.sitofp %16 : vector<128x128xi32> to vector<128x128xf32>
    %c0_3 = arith.constant 0 : index
    %c0_4 = arith.constant 0 : index
    %18 = vector.load %arg5[%c0_3, %c0_4] : memref<128x128xf32, #tpu.memory_space<vmem>>, vector<128x128xf32>
    %cst = arith.constant dense<0.000000e+00> : vector<128x128xf32>
    %19 = tpu.matmul %17, %8, %cst {dimension_numbers = #tpu.dot_dimension_numbers<[1], [0], [0], [1], [0, 0, 1, 1], [], []>} : vector<128x128xf32>, vector<128x128xf32>, vector<128x128xf32> -> vector<128x128xf32>
    %20 = arith.addf %18, %19 : vector<128x128xf32>
    %c0_5 = arith.constant 0 : index
    %c0_6 = arith.constant 0 : index
    %21 = vector.load %arg5[%c0_5, %c0_6] : memref<128x128xf32, #tpu.memory_space<vmem>>, vector<128x128xf32>
    tpu.vector_store %arg5[%c0_5, %c0_6], %20 {strides = array<i32>} : memref<128x128xf32, #tpu.memory_space<vmem>>, vector<128x128xf32>,
    %c0_i32_7 = arith.constant 0 : i32
    %22 = arith.cmpi eq, %arg1, %c0_i32_7 : i32
    %23 = arith.extui %22 : i1 to i32
    %c0_i32_8 = arith.constant 0 : i32
    %24 = arith.cmpi ne, %23, %c0_i32_8 : i32
    scf.if %24 {
      %c0_9 = arith.constant 0 : index
      %c0_10 = arith.constant 0 : index
      %25 = vector.load %arg5[%c0_9, %c0_10] : memref<128x128xf32, #tpu.memory_space<vmem>>, vector<128x128xf32>
      %26 = vector.extract_strided_slice %25 {offsets = [0, 32], sizes = [128, 1], strides = [1, 1]} : vector<128x128xf32> to vector<128x1xf32>
      %cst_11 = arith.constant 1.000000e+00 : f32
      %27 = vector.broadcast %cst_11 : f32 to vector<128x1xf32>
      %28 = arith.maximumf %26, %27 : vector<128x1xf32>
      %29 = tpu.reciprocal %28 : vector<128x1xf32> -> vector<128x1xf32>
      %30 = vector.broadcast %29 : vector<128x1xf32> to vector<128x128xf32>
      %31 = arith.mulf %25, %30 : vector<128x128xf32>
      %c0_12 = arith.constant 0 : index
      %c0_13 = arith.constant 0 : index
      %32 = vector.load %arg4[%c0_12, %c0_13] : memref<128x128xf32, #tpu.memory_space<vmem>>, vector<128x128xf32>
      tpu.vector_store %arg4[%c0_12, %c0_13], %31 {strides = array<i32>} : memref<128x128xf32, #tpu.memory_space<vmem>>, vector<128x128xf32>,
    } else {
    }
    return
  }
  func.func @transform_0(%arg0: i32, %arg1: i32) -> (i32, i32) {
    %c0_i32 = arith.constant 0 : i32
    %c0_i32_0 = arith.constant 0 : i32
    %c0_i32_1 = arith.constant 0 : i32
    return %c0_i32, %c0_i32_0 : i32, i32
  }
  func.func @transform_1(%arg0: i32, %arg1: i32) -> (i32, i32) {
    %c0_i32 = arith.constant 0 : i32
    %c0_i32_0 = arith.constant 0 : i32
    %c0_i32_1 = arith.constant 0 : i32
    return %c0_i32, %c0_i32_0 : i32, i32
  }
  func.func @transform_2(%arg0: i32, %arg1: i32) -> (i32, i32) {
    %c0_i32 = arith.constant 0 : i32
    %c0_i32_0 = arith.constant 0 : i32
    return %arg0, %c0_i32 : i32, i32
  }
}

</mosaic_0001>

<bundles_post_ra>
// kernel: tpu_custom_call.1
= control target key start
LH: loop header
LB: loop body
LE: loop exit
PB: predicated region body
PF: predicated region fallthrough
CT: control target
= control target key end

     0   :  { %7 = vsyncpa [#allocation4], 0  ;;  %s899_s0 = inlined_call_operand.hbm [shape: s32[1,128], index: 0, kind: input, shape index: {}]   ;;  %s900_s1 = inlined_call_operand.hbm [shape: f32[128,128], index: 1, kind: input, shape index: {}]   ;;  %s901_s2 = inlined_call_operand.hbm [shape: f32[128,128], index: 2, kind: output, shape index: {}]  }
   0x1   :  { %8 = vsyncpa [#allocation7], 0 }
   0x2   :  { %9 = vsyncpa [#allocation5], 0  ;;  %s798_s9 = smov [#allocation3]   ;;  %s799_s11 = smov [#allocation6]  }
   0x3   :  { %s16_s10 = sshll.u32 %s798_s9, 4  ;;  %s25_s12 = sshll.u32 %s799_s11, 4  ;;  %s17_s10 = int_to_ptr.vmem [resolvable:$true] %s16_s10  ;;  %s26_s12 = int_to_ptr.vmem [resolvable:$true] %s25_s12 }
   0x4   :  { %s740_s13 = scalar_lea.vmem %s17_s10, 16  ;;  %s744_s14 = scalar_lea.vmem %s17_s10, 32 }
   0x5   :  { %p741_p0 = scmp.ne.s32.totalorder %s17_s10, %s740_s13  ;;  %p745_p1 = scmp.lt.s32.totalorder %s17_s10, %s17_s10 }
   0x6   :  { %p746_p2 = scmp.lt.s32.totalorder %s744_s14, %s740_s13 }
   0x8   :  { %p747_p3 = por %p746_p2, %p745_p1 }
   0xa   :  { %p748_p4 = pnand %p747_p3, %p741_p0 }
   0xc   :  { %751 = shalt.err (!%p748_p4)
}
   0xd   :  { %19 = dma.hbm_to_vmem [thread:$0]  %s899_s0, 16, %s17_s10, [#allocation4]  }
   0xe   :  { %s760_s17 = scalar_lea.vmem %s26_s12, 2048  ;;  %p765_p6 = scmp.lt.s32.totalorder %s26_s12, %s26_s12 }
   0xf   :  { %p761_p5 = scmp.ne.s32.totalorder %s26_s12, %s760_s17  ;;  %p766_p7 = scmp.lt.s32.totalorder %s760_s17, %s760_s17 }
  0x11   :  { %p767_p8 = por %p766_p7, %p765_p6 }
  0x13   :  { %p768_p9 = pnand %p767_p8, %p761_p5 }
  0x15   :  { %771 = shalt.err (!%p768_p9)
}
  0x16   :  { %s800_s18 = smov 128   ;;  %s801_s19 = smov 8  }
  0x17   :  { %31 = dma.hbm_to_vmem [thread:$0]  %s900_s1, 2048, %s26_s12, [#allocation7], %s800_s18, %s800_s18, %s801_s19  }
  0x18   :  { %792 = dma.done.wait [#allocation4], 16  }
  0x19   :  { %793 = vsyncadd [#allocation4], 4294967280 }
  0x1a   :  { %794 = dma.done.wait [#allocation7], 2048  }
  0x1b   :  { %795 = vsyncadd [#allocation7], 4294965248  ;;  %v76_v0 = vld [vmem:[#allocation6 + $0x78] sm:$0xff]  ;;  %v75_v1 = vld [vmem:[#allocation6 + $0x70] sm:$0xff]  ;;  %v77_v11 = vlaneseq  ;;  %v802_v28 = vmov 1.0   ;;  %v803_v35 = vmov 32  }
  0x1c   :  { %603 = vmatprep.subr.mxu0 %v76_v0  ;;  %659 = vmatprep.subr.mxu1 %v76_v0  ;;  %v74_v2 = vld [vmem:[#allocation6 + $0x68] sm:$0xff]  ;;  %v73_v3 = vld [vmem:[#allocation6 + $0x60] sm:$0xff]  ;;  %v72_v4 = vld [vmem:[#allocation6 + $0x58] sm:$0xff]  ;;  %s804_s0 = smov [#allocation8]  }
  0x1d   :  { %604 = vmatpush3.msra.mxu0 %v76_v0  ;;  %675 = vmatpush3.msra.mxu1 %v76_v0  ;;  %v71_v5 = vld [vmem:[#allocation6 + $0x50] sm:$0xff]  ;;  %v70_v6 = vld [vmem:[#allocation6 + $0x48] sm:$0xff]  ;;  %v69_v7 = vld [vmem:[#allocation6 + $0x40] sm:$0xff]  ;;  %v78_v14 = vshrl.u32 %v77_v11, 7  ;;  %s525_s1 = sshll.u32 %s804_s0, 4  ;;  %s526_s1 = int_to_ptr.vmem [resolvable:$true] %s525_s1 }
  0x1e   :  { %605 = vmatprep.subr.mxu0 %v75_v1  ;;  %660 = vmatprep.subr.mxu1 %v75_v1  ;;  %v68_v8 = vld [vmem:[#allocation6 + $0x38] sm:$0xff]  ;;  %v67_v9 = vld [vmem:[#allocation6 + $0x30] sm:$0xff]  ;;  %v66_v10 = vld [vmem:[#allocation6 + $0x28] sm:$0xff]  ;;  %s772_s22 = scalar_lea.vmem %s526_s1, 2048  ;;  %p777_p11 = scmp.lt.s32.totalorder %s526_s1, %s526_s1 }
  0x1f   :  { %606 = vmatpush3.msra.mxu0 %v75_v1  ;;  %676 = vmatpush3.msra.mxu1 %v75_v1  ;;  %v65_v12 = vld [vmem:[#allocation6 + $0x20] sm:$0xff]  ;;  %v64_v13 = vld [vmem:[#allocation6 + $0x18] sm:$0xff]  ;;  %v63_v15 = vld [vmem:[#allocation6 + $0x10] sm:$0xff]  ;;  %v86_v17 = vadd.s32 64, %v78_v14  ;;  %v79_v19 = vadd.s32 8, %v78_v14  ;;  %v87_v20 = vadd.s32 72, %v78_v14  ;;  %p773_p10 = scmp.ne.s32.totalorder %s526_s1, %s772_s22  ;;  %p778_p12 = scmp.lt.s32.totalorder %s772_s22, %s772_s22 }
  0x20   :  { %607 = vmatprep.subr.mxu0 %v74_v2  ;;  %661 = vmatprep.subr.mxu1 %v74_v2  ;;  %v62_v16 = vld [vmem:[#allocation6 + $0x8] sm:$0xff]  ;;  %v538_v18 = vld [vmem:[#allocation3] ss:$0 sm:$0xff]  ;;  %v61_v21 = vld [vmem:[#allocation6] sm:$0xff]  ;;  %v80_v22 = vadd.s32 16, %v78_v14  ;;  %v88_v23 = vadd.s32 80, %v78_v14 }
  0x21   :  { %608 = vmatpush3.msra.mxu0 %v74_v2  ;;  %677 = vmatpush3.msra.mxu1 %v74_v2  ;;  %vm116_vm0 = vcmp.eq.s32.totalorder %v78_v14, %v538_v18  ;;  %vm124_vm1 = vcmp.eq.s32.totalorder %v86_v17, %v538_v18  ;;  %vm117_vm2 = vcmp.eq.s32.totalorder %v79_v19, %v538_v18  ;;  %v81_v24 = vadd.s32 24, %v78_v14  ;;  %p779_p13 = por %p778_p12, %p777_p11 }
  0x22   :  { %609 = vmatprep.subr.mxu0 %v73_v3  ;;  %662 = vmatprep.subr.mxu1 %v73_v3  ;;  %vm125_vm3 = vcmp.eq.s32.totalorder %v87_v20, %v538_v18  ;;  %v89_v25 = vadd.s32 88, %v78_v14  ;;  %vm118_vm4 = vcmp.eq.s32.totalorder %v80_v22, %v538_v18  ;;  %vm126_vm5 = vcmp.eq.s32.totalorder %v88_v23, %v538_v18 }
  0x23   :  { %610 = vmatpush3.msra.mxu0 %v73_v3  ;;  %678 = vmatpush3.msra.mxu1 %v73_v3  ;;  %v82_v26 = vadd.s32 32, %v78_v14  ;;  %v90_v27 = vadd.s32 96, %v78_v14  ;;  %vm119_vm6 = vcmp.eq.s32.totalorder %v81_v24, %v538_v18  ;;  %v83_v29 = vadd.s32 40, %v78_v14  ;;  %p780_p0 = pnand %p779_p13, %p773_p10 }
  0x24   :  { %611 = vmatprep.subr.mxu0 %v72_v4  ;;  %663 = vmatprep.subr.mxu1 %v72_v4  ;;  %vm127_vm7 = vcmp.eq.s32.totalorder %v89_v25, %v538_v18  ;;  %v91_v30 = vadd.s32 104, %v78_v14  ;;  %v84_v31 = vadd.s32 48, %v78_v14  ;;  %v92_v32 = vadd.s32 112, %v78_v14 }
  0x25   :  { %612 = vmatpush3.msra.mxu0 %v72_v4  ;;  %679 = vmatpush3.msra.mxu1 %v72_v4  ;;  %vm120_vm8 = vcmp.eq.s32.totalorder %v82_v26, %v538_v18  ;;  %vm128_vm9 = vcmp.eq.s32.totalorder %v90_v27, %v538_v18  ;;  %vm121_vm10 = vcmp.eq.s32.totalorder %v83_v29, %v538_v18  ;;  %v85_v33 = vadd.s32 56, %v78_v14 }
  0x26   :  { %613 = vmatprep.subr.mxu0 %v71_v5  ;;  %664 = vmatprep.subr.mxu1 %v71_v5  ;;  %vm129_vm11 = vcmp.eq.s32.totalorder %v91_v30, %v538_v18  ;;  %v93_v34 = vadd.s32 120, %v78_v14  ;;  %vm122_vm12 = vcmp.eq.s32.totalorder %v84_v31, %v538_v18  ;;  %vm130_vm13 = vcmp.eq.s32.totalorder %v92_v32, %v538_v18 }
  0x27   :  { %614 = vmatpush3.msra.mxu0 %v71_v5  ;;  %680 = vmatpush3.msra.mxu1 %v71_v5  ;;  %vm123_vm14 = vcmp.eq.s32.totalorder %v85_v33, %v538_v18 }
  0x28   :  { %615 = vmatprep.subr.mxu0 %v70_v6  ;;  %665 = vmatprep.subr.mxu1 %v70_v6  ;;  %vm131_vm15 = vcmp.eq.s32.totalorder %v93_v34, %v538_v18 }
  0x29   :  { %616 = vmatpush3.msra.mxu0 %v70_v6  ;;  %681 = vmatpush3.msra.mxu1 %v70_v6 }
  0x2a   :  { %617 = vmatprep.subr.mxu0 %v69_v7  ;;  %666 = vmatprep.subr.mxu1 %v69_v7 }
  0x2b   :  { %618 = vmatpush3.msra.mxu0 %v69_v7  ;;  %682 = vmatpush3.msra.mxu1 %v69_v7 }
  0x2c   :  { %619 = vmatprep.subr.mxu0 %v68_v8  ;;  %667 = vmatprep.subr.mxu1 %v68_v8 }
  0x2d   :  { %620 = vmatpush3.msra.mxu0 %v68_v8  ;;  %683 = vmatpush3.msra.mxu1 %v68_v8 }
  0x2e   :  { %621 = vmatprep.subr.mxu0 %v67_v9  ;;  %668 = vmatprep.subr.mxu1 %v67_v9 }
  0x2f   :  { %622 = vmatpush3.msra.mxu0 %v67_v9  ;;  %684 = vmatpush3.msra.mxu1 %v67_v9 }
  0x30   :  { %623 = vmatprep.subr.mxu0 %v66_v10  ;;  %669 = vmatprep.subr.mxu1 %v66_v10 }
  0x31   :  { %624 = vmatpush3.msra.mxu0 %v66_v10  ;;  %685 = vmatpush3.msra.mxu1 %v66_v10 }
  0x32   :  { %625 = vmatprep.subr.mxu0 %v65_v12  ;;  %670 = vmatprep.subr.mxu1 %v65_v12 }
  0x33   :  { %626 = vmatpush3.msra.mxu0 %v65_v12  ;;  %686 = vmatpush3.msra.mxu1 %v65_v12 }
  0x34   :  { %627 = vmatprep.subr.mxu0 %v64_v13  ;;  %671 = vmatprep.subr.mxu1 %v64_v13 }
  0x35   :  { %628 = vmatpush3.msra.mxu0 %v64_v13  ;;  %687 = vmatpush3.msra.mxu1 %v64_v13 }
  0x36   :  { %629 = vmatprep.subr.mxu0 %v63_v15  ;;  %672 = vmatprep.subr.mxu1 %v63_v15 }
  0x37   :  { %630 = vmatpush3.msra.mxu0 %v63_v15  ;;  %688 = vmatpush3.msra.mxu1 %v63_v15 }
  0x38   :  { %631 = vmatprep.subr.mxu0 %v62_v16  ;;  %673 = vmatprep.subr.mxu1 %v62_v16 }
  0x39   :  { %632 = vmatpush3.msra.mxu0 %v62_v16  ;;  %689 = vmatpush3.msra.mxu1 %v62_v16 }
  0x3a   :  { %633 = vmatprep.subr.mxu0 %v61_v21  ;;  %674 = vmatprep.subr.mxu1 %v61_v21 }
  0x3b   :  { %634 = vmatpush3.msra.mxu0 %v61_v21  ;;  %690 = vmatpush3.msra.mxu1 %v61_v21 }
  0x3c   :  { %635 = vmatprep.mubr.msk.f32.mxu0 %vm116_vm0, %v802_v28  ;;  %647 = vmatprep.mubr.msk.f32.mxu1 %vm124_vm1, %v802_v28 }
  0x3d   :  { %636 = vmatmul.mubr.msk.f32.vlgmr.msra.gmra.mxu0 %vm117_vm2, %v802_v28  ;;  %648 = vmatmul.mubr.msk.f32.vlgmr.msra.gmra.mxu1 %vm125_vm3, %v802_v28 }
  0x3e   :  { %638 = vmatprep.mubr.msk.f32.mxu0 %vm118_vm4, %v802_v28  ;;  %650 = vmatprep.mubr.msk.f32.mxu1 %vm126_vm5, %v802_v28 }
  0x3f   :  { %699 = vset.pattern.permute.xlu1 %v803_v35  ;;  %698 = vset.pattern.permute.xlu0 %v803_v35 }
  0x41   :  { %639 = vmatmul.mubr.msk.f32.gmra.mxu0 %vm119_vm6, %v802_v28  ;;  %651 = vmatmul.mubr.msk.f32.gmra.mxu1 %vm127_vm7, %v802_v28 }
  0x42   :  { %641 = vmatprep.mubr.msk.f32.mxu0 %vm120_vm8, %v802_v28  ;;  %653 = vmatprep.mubr.msk.f32.mxu1 %vm128_vm9, %v802_v28 }
  0x45   :  { %642 = vmatmul.mubr.msk.f32.gmra.mxu0 %vm121_vm10, %v802_v28  ;;  %654 = vmatmul.mubr.msk.f32.gmra.mxu1 %vm129_vm11, %v802_v28 }
  0x46   :  { %644 = vmatprep.mubr.msk.f32.mxu0 %vm122_vm12, %v802_v28  ;;  %656 = vmatprep.mubr.msk.f32.mxu1 %vm130_vm13, %v802_v28 }
  0x49   :  { %645 = vmatmul.mubr.msk.f32.gmra.mxu0 %vm123_vm14, %v802_v28  ;;  %657 = vmatmul.mubr.msk.f32.gmra.mxu1 %vm131_vm15, %v802_v28 }
  0xfd   :  { %v829_v36 = vpop.f32.mrf.mxu0  ;;  %v831_v37 = vpop.f32.mrf.mxu1 }
  0xfe   :  { %v377_v38 = vmax.f32 %v829_v36, 1.0  ;;  %v385_v39 = vmax.f32 %v831_v37, 1.0 }
  0xff   :  { %v835_v40 = vpop.f32.mrf.mxu0  ;;  %v837_v41 = vpop.f32.mrf.mxu1 }
 0x100   :  { %700 = vrcp.f32 %v377_v38  ;;  %v376_v42 = vmax.f32 %v835_v40, 1.0  ;;  %v384_v48 = vmax.f32 %v837_v41, 1.0 }
 0x101   :  { %702 = vrcp.f32 %v385_v39  ;;  %v840_v43 = vpop.f32.mrf.mxu0  ;;  %v842_v44 = vpop.f32.mrf.mxu1 }
 0x102   :  { %v379_v45 = vmax.f32 %v840_v43, 1.0  ;;  %704 = vrcp.f32 %v376_v42  ;;  %v387_v47 = vmax.f32 %v842_v44, 1.0 }
 0x103   :  { %v845_v46 = vpop.f32.mrf.mxu0  ;;  %v849_v49 = vpop.f32.mrf.mxu1 }
 0x104   :  { %706 = vrcp.f32 %v379_v45  ;;  %v386_v51 = vmax.f32 %v849_v49, 1.0  ;;  %v378_v52 = vmax.f32 %v845_v46, 1.0 }
 0x105   :  { %v851_v50 = vpop.f32.mrf.mxu0  ;;  %708 = vrcp.f32 %v387_v47  ;;  %v857_v54 = vpop.f32.mrf.mxu1 }
 0x106   :  { %710 = vrcp.f32 %v384_v48  ;;  %v381_v57 = vmax.f32 %v851_v50, 1.0  ;;  %v389_v0 = vmax.f32 %v857_v54, 1.0 }
 0x107   :  { %v855_v53 = vpop.f32.mrf.mxu0  ;;  %712 = vrcp.f32 %v386_v51  ;;  %v861_v58 = vpop.f32.mrf.mxu1 }
 0x108   :  { %v380_v55 = vmax.f32 %v855_v53, 1.0  ;;  %714 = vrcp.f32 %v378_v52  ;;  %v388_v62 = vmax.f32 %v861_v58, 1.0 }
 0x109   :  { %v863_v59 = vpop.f32.mrf.mxu0  ;;  %v869_v2 = vpop.f32.mrf.mxu1 }
 0x10a   :  { %716 = vrcp.f32 %v380_v55  ;;  %v383_v6 = vmax.f32 %v863_v59, 1.0  ;;  %v391_v10 = vmax.f32 %v869_v2, 1.0 }
 0x10b   :  { %718 = vrcp.f32 %v381_v57  ;;  %v867_v1 = vpop.f32.mrf.mxu0  ;;  %v873_v7 = vpop.f32.mrf.mxu1 }
 0x10c   :  { %720 = vrcp.f32 %v388_v62  ;;  %v382_v4 = vmax.f32 %v867_v1, 1.0  ;;  %v390_v8 = vmax.f32 %v873_v7, 1.0 }
 0x10d   :  { %v701_v56 = vpop.eup %700  ;;  %722 = vrcp.f32 %v389_v0 }
 0x10e   :  { %v703_v60 = vpop.eup %702  ;;  %415 = vperm.xlu0 %698, %v701_v56   ;;  %724 = vrcp.f32 %v382_v4 }
 0x10f   :  { %455 = vperm.xlu1 %699, %v703_v60   ;;  %v705_v61 = vpop.eup %704  ;;  %726 = vrcp.f32 %v383_v6 }
 0x110   :  { %728 = vrcp.f32 %v390_v8 }
 0x111   :  { %v707_v63 = vpop.eup %706  ;;  %730 = vrcp.f32 %v391_v10 }
 0x112   :  { %410 = vperm.xlu0 %698, %v705_v61   ;;  %v709_v3 = vpop.eup %708 }
 0x113   :  { %425 = vperm.xlu1 %699, %v707_v63   ;;  %v711_v5 = vpop.eup %710 }
 0x114   :  { %v713_v9 = vpop.eup %712 }
 0x115   :  { %v715_v11 = vpop.eup %714 }
 0x116   :  { %450 = vperm.xlu0 %698, %v711_v5  }
 0x117   :  { %465 = vperm.xlu1 %699, %v709_v3   ;;  %v717_v12 = vpop.eup %716 }
 0x118   :  { %v719_v13 = vpop.eup %718 }
 0x119   :  { %v721_v14 = vpop.eup %720 }
 0x11a   :  { %460 = vperm.xlu0 %698, %v713_v9   ;;  %v723_v15 = vpop.eup %722 }
 0x11b   :  { %420 = vperm.xlu1 %699, %v715_v11   ;;  %v725_v16 = vpop.eup %724 }
 0x11c   :  { %v727_v17 = vpop.eup %726 }
 0x11d   :  { %v729_v18 = vpop.eup %728 }
 0x11e   :  { %430 = vperm.xlu0 %698, %v717_v12   ;;  %v731_v19 = vpop.eup %730 }
 0x11f   :  { %435 = vperm.xlu1 %699, %v719_v13  }
 0x122   :  { %470 = vperm.xlu0 %698, %v721_v14  }
 0x123   :  { %475 = vperm.xlu1 %699, %v723_v15  }
 0x126   :  { %440 = vperm.xlu0 %698, %v725_v16  }
 0x127   :  { %445 = vperm.xlu1 %699, %v727_v17  }
 0x12a   :  { %480 = vperm.xlu0 %698, %v729_v18  }
 0x12b   :  { %485 = vperm.xlu1 %699, %v731_v19  }
 0x189   :  { %v416_v20 = vpop.permute.xlu0 %415 }
 0x18a   :  { %v456_v21 = vpop.permute.xlu1 %455  ;;  %v489_v22 = vmul.f32 %v829_v36, %v416_v20 }
 0x18b   :  { %v497_v23 = vmul.f32 %v831_v37, %v456_v21 }
 0x18c   :  { %505 = vst [vmem:[#allocation8 + $0x8] sm:$0xff] %v489_v22 }
 0x18d   :  { %513 = vst [vmem:[#allocation8 + $0x48] sm:$0xff] %v497_v23  ;;  %v411_v24 = vpop.permute.xlu0 %410 }
 0x18e   :  { %v488_v25 = vmul.f32 %v411_v24, %v835_v40  ;;  %v426_v26 = vpop.permute.xlu1 %425 }
 0x18f   :  { %v491_v27 = vmul.f32 %v840_v43, %v426_v26 }
 0x190   :  { %504 = vst [vmem:[#allocation8] sm:$0xff] %v488_v25 }
 0x191   :  { %507 = vst [vmem:[#allocation8 + $0x18] sm:$0xff] %v491_v27  ;;  %v451_v28 = vpop.permute.xlu0 %450 }
 0x192   :  { %v496_v29 = vmul.f32 %v451_v28, %v837_v41  ;;  %v466_v30 = vpop.permute.xlu1 %465 }
 0x193   :  { %v499_v31 = vmul.f32 %v842_v44, %v466_v30 }
 0x194   :  { %512 = vst [vmem:[#allocation8 + $0x40] sm:$0xff] %v496_v29 }
 0x195   :  { %515 = vst [vmem:[#allocation8 + $0x58] sm:$0xff] %v499_v31  ;;  %v461_v32 = vpop.permute.xlu0 %460 }
 0x196   :  { %v498_v33 = vmul.f32 %v461_v32, %v849_v49  ;;  %v421_v34 = vpop.permute.xlu1 %420 }
 0x197   :  { %v490_v35 = vmul.f32 %v421_v34, %v845_v46 }
 0x198   :  { %514 = vst [vmem:[#allocation8 + $0x50] sm:$0xff] %v498_v33 }
 0x199   :  { %506 = vst [vmem:[#allocation8 + $0x10] sm:$0xff] %v490_v35  ;;  %v431_v36 = vpop.permute.xlu0 %430 }
 0x19a   :  { %v436_v37 = vpop.permute.xlu1 %435  ;;  %v492_v38 = vmul.f32 %v431_v36, %v855_v53 }
 0x19b   :  { %v493_v39 = vmul.f32 %v851_v50, %v436_v37 }
 0x19c   :  { %508 = vst [vmem:[#allocation8 + $0x20] sm:$0xff] %v492_v38 }
 0x19d   :  { %509 = vst [vmem:[#allocation8 + $0x28] sm:$0xff] %v493_v39  ;;  %v471_v40 = vpop.permute.xlu0 %470 }
 0x19e   :  { %v476_v41 = vpop.permute.xlu1 %475  ;;  %v500_v42 = vmul.f32 %v471_v40, %v861_v58 }
 0x19f   :  { %v501_v43 = vmul.f32 %v857_v54, %v476_v41 }
 0x1a0   :  { %516 = vst [vmem:[#allocation8 + $0x60] sm:$0xff] %v500_v42 }
 0x1a1   :  { %517 = vst [vmem:[#allocation8 + $0x68] sm:$0xff] %v501_v43  ;;  %v441_v44 = vpop.permute.xlu0 %440 }
 0x1a2   :  { %v446_v45 = vpop.permute.xlu1 %445  ;;  %v494_v46 = vmul.f32 %v441_v44, %v867_v1 }
 0x1a3   :  { %v495_v47 = vmul.f32 %v863_v59, %v446_v45 }
 0x1a4   :  { %510 = vst [vmem:[#allocation8 + $0x30] sm:$0xff] %v494_v46 }
 0x1a5   :  { %511 = vst [vmem:[#allocation8 + $0x38] sm:$0xff] %v495_v47  ;;  %v481_v48 = vpop.permute.xlu0 %480 }
 0x1a6   :  { %v486_v49 = vpop.permute.xlu1 %485  ;;  %v502_v50 = vmul.f32 %v481_v48, %v873_v7 }
 0x1a7   :  { %v503_v51 = vmul.f32 %v869_v2, %v486_v49 }
 0x1a8   :  { %518 = vst [vmem:[#allocation8 + $0x70] sm:$0xff] %v502_v50 }
 0x1a9   :  { %519 = vst [vmem:[#allocation8 + $0x78] sm:$0xff] %v503_v51 }
 0x1aa   :  { %783 = shalt.err (!%p780_p0)
}
 0x1ab   :  { %531 = dma.vmem_to_hbm [thread:$0]  %s526_s1, 2048, %s901_s2, [#allocation5], %s800_s18, %s800_s18, %s801_s19  }
 0x1ac   :  { %796 = dma.done.wait [#allocation5], 2048  }
 0x1ad   :  { %797 = vsyncadd [#allocation5], 4294965248 }
 0x1ae   :  { %535 = vsyncpa [#allocation4], 1 }
 0x1af   :  { %536 = vsyncpa [#allocation7], 1 }
 0x1b0   :  { %537 = vsyncpa [#allocation5], 1 }

</bundles_post_ra>
